<compile_context>
chip_gen: v7x
topology: tpu7x:2x2x1
jax: 0.10.0
libtpu: 0.0.40
codegen_flags: <defaults>
</compile_context>

<pallas_src>
import jax
import jax.numpy as jnp
from jax.experimental import pallas as pl
from jax.experimental.pallas import tpu as pltpu

LN_EPS = 1e-5


def _mlp_time_kernel(x_ref, gamma_ref, beta_ref, w_ref, bias_ref, o_ref):
    """One (t_in, block_nc) column tile of one batch element.

    x_ref:     (1, t_in, block_nc)   input tile (columns = (n, c) positions)
    gamma_ref: (t_in, 1)             LayerNorm scale
    beta_ref:  (t_in, 1)             LayerNorm shift
    w_ref:     (t_out, t_in)         Linear weight (PyTorch layout)
    bias_ref:  (t_out, 1)            Linear bias
    o_ref:     (1, t_out, block_nc)  output tile
    """
    x = x_ref[0].astype(jnp.float32)                       # (t_in, block_nc)

    # LayerNorm over the time axis (axis 0 of the tile), per column.
    mean = jnp.mean(x, axis=0, keepdims=True)              # (1, block_nc)
    centered = x - mean
    var = jnp.mean(centered * centered, axis=0, keepdims=True)
    xn = centered * jax.lax.rsqrt(var + LN_EPS)
    xn = (xn * gamma_ref[...].astype(jnp.float32)
          + beta_ref[...].astype(jnp.float32))

    # Linear + bias + ReLU.  Cast activations to the weight dtype so a bf16
    # weight takes the native bf16 x bf16 -> f32 MXU path; accumulate in f32.
    y = jnp.dot(w_ref[...], xn.astype(w_ref.dtype),
                preferred_element_type=jnp.float32)        # (t_out, block_nc)
    y = y + bias_ref[...].astype(jnp.float32)
    o_ref[0] = jnp.maximum(y, 0.0).astype(o_ref.dtype)


def mlp_time_graph(x, gamma, beta, w, bias, *, block_nc=2048):
    """x: (b, t_in, n, c) -> (b, t_out, n, c), matching MLPTimeGraph.forward.

    gamma/beta: (t_in,) LayerNorm params.  w: (t_out, t_in) PyTorch Linear
    weight.  bias: (t_out,).
    """
    b, t_in, n, c = x.shape
    t_out, t_in_w = w.shape
    assert t_in_w == t_in, (w.shape, t_in)
    N = n * c

    # Free reshapes only — no HBM transpose / pad round trips.
    x3 = x.reshape(b, t_in, N)
    gamma2 = gamma.reshape(t_in, 1)
    beta2 = beta.reshape(t_in, 1)
    bias2 = bias.reshape(t_out, 1)

    # Column tile: whole array if it fits, else a multiple of 128 lanes.
    # A trailing partial block is handled by Pallas' masked edge-block
    # stores, so no padding is needed.
    if N <= block_nc:
        block_nc_eff = N
    else:
        assert block_nc % 128 == 0, "block_nc must be a multiple of 128"
        block_nc_eff = block_nc
    grid = (b, pl.cdiv(N, block_nc_eff))

    # VMEM budget: double-buffered in/out tiles + resident params.
    # (gamma/beta/w/bias have constant index maps so they are fetched once;
    #  their footprint is a few KiB, so Buffered(1) would buy ~nothing here.)
    itemsize = jnp.dtype(x.dtype).itemsize
    tile_bytes = (t_in + t_out) * block_nc_eff * itemsize
    param_bytes = (w.size + gamma.size + beta.size + bias.size) * 4
    vmem_need = 2 * tile_bytes + 2 * param_bytes
    cp_kwargs = dict(dimension_semantics=("parallel", "parallel"))
    if vmem_need > 8 * 1024 * 1024:
        # Only override the scoped-VMEM default when a large block_nc needs it
        # (keeps headroom on v7x's smaller 64 MiB physical VMEM).
        cp_kwargs["vmem_limit_bytes"] = int(min(4 * vmem_need, 100 * 1024 * 1024))

    out3 = pl.pallas_call(
        _mlp_time_kernel,
        out_shape=jax.ShapeDtypeStruct((b, t_out, N), x.dtype),
        grid_spec=pltpu.PrefetchScalarGridSpec(
            num_scalar_prefetch=0,
            grid=grid,
            in_specs=[
                pl.BlockSpec((1, t_in, block_nc_eff), lambda bi, ji: (bi, 0, ji)),
                pl.BlockSpec((t_in, 1), lambda bi, ji: (0, 0)),
                pl.BlockSpec((t_in, 1), lambda bi, ji: (0, 0)),
                pl.BlockSpec((t_out, t_in), lambda bi, ji: (0, 0)),
                pl.BlockSpec((t_out, 1), lambda bi, ji: (0, 0)),
            ],
            out_specs=pl.BlockSpec((1, t_out, block_nc_eff),
                                   lambda bi, ji: (bi, 0, ji)),
        ),
        compiler_params=pltpu.CompilerParams(**cp_kwargs),
    )(x3, gamma2, beta2, w, bias2)

    return out3.reshape(b, t_out, n, c)


def _reference(x, gamma, beta, w, bias):
    # Direct transliteration of the PyTorch module (permute/reshape based).
    b, t_in, n, c = x.shape
    t_out = w.shape[0]
    x2d = jnp.transpose(x, (0, 2, 3, 1)).reshape(-1, t_in).astype(jnp.float32)
    mean = jnp.mean(x2d, axis=-1, keepdims=True)
    var = jnp.mean((x2d - mean) ** 2, axis=-1, keepdims=True)
    xn = (x2d - mean) / jnp.sqrt(var + LN_EPS) * gamma + beta
    y = jnp.maximum(xn @ w.T + bias, 0.0)
    return jnp.transpose(y.reshape(b, n, c, t_out), (0, 3, 1, 2)).astype(x.dtype)


if __name__ == "__main__":
    key = jax.random.PRNGKey(0)

    def make_case(k, b, t_in, n, c, t_out):
        k_x, k_w, k_b, k_g, k_be = jax.random.split(k, 5)
        x = jax.random.normal(k_x, (b, t_in, n, c), dtype=jnp.float32)
        gamma = 1.0 + 0.1 * jax.random.normal(k_g, (t_in,), dtype=jnp.float32)
        beta = 0.1 * jax.random.normal(k_be, (t_in,), dtype=jnp.float32)
        w = jax.random.normal(k_w, (t_out, t_in), dtype=jnp.float32) / jnp.sqrt(t_in)
        bias = 0.1 * jax.random.normal(k_b, (t_out,), dtype=jnp.float32)
        return x, gamma, beta, w, bias

    k1, k2 = jax.random.split(key)

    # Case 1: small module-like shapes (b=2, t_in=8, n=4, c=4, t_out=16).
    x, gamma, beta, w, bias = make_case(k1, b=2, t_in=8, n=4, c=4, t_out=16)
    out = jax.block_until_ready(mlp_time_graph(x, gamma, beta, w, bias))
    ref = _reference(x, gamma, beta, w, bias)
    assert out.shape == (2, 16, 4, 4), out.shape
    assert jnp.allclose(out, ref, atol=1e-4, rtol=1e-4), "case 1 mismatch"

    # Case 2: multi-block grid with a partial trailing column block
    # (n*c = 260 columns, block_nc = 128 -> grid (2, 3), last block masked).
    x, gamma, beta, w, bias = make_case(k2, b=2, t_in=12, n=5, c=52, t_out=12)
    out = jax.block_until_ready(
        mlp_time_graph(x, gamma, beta, w, bias, block_nc=128))
    ref = _reference(x, gamma, beta, w, bias)
    assert out.shape == (2, 12, 5, 52), out.shape
    assert jnp.allclose(out, ref, atol=1e-4, rtol=1e-4), "case 2 mismatch"

    print("KERNEL_OK")
</pallas_src>

<mosaic_0001>
module attributes {stable_mosaic.version = 11 : i64} {
  func.func @_mlp_time_kernel(%arg0: i32, %arg1: i32, %arg2: memref<1x8x16xf32, #tpu.memory_space<vmem>>, %arg3: memref<8x1xf32, #tpu.memory_space<vmem>>, %arg4: memref<8x1xf32, #tpu.memory_space<vmem>>, %arg5: memref<16x8xf32, #tpu.memory_space<vmem>>, %arg6: memref<16x1xf32, #tpu.memory_space<vmem>>, %arg7: memref<1x16x16xf32, #tpu.memory_space<vmem>>) attributes {dimension_semantics = [#tpu.dimension_semantics<parallel>, #tpu.dimension_semantics<parallel>], iteration_bounds = array<i64: 2, 1>, scalar_prefetch = 0 : i64, scratch_operands = 0 : i64, tpu.core_type = #tpu.core_type<tc>, window_params = [{transform_indices = @transform_0, window_bounds = array<i64: 1, 8, 16>}, {pipeline_mode = #tpu.pipeline_mode<synchronous>, transform_indices = @transform_1, window_bounds = array<i64: 8, 1>}, {pipeline_mode = #tpu.pipeline_mode<synchronous>, transform_indices = @transform_2, window_bounds = array<i64: 8, 1>}, {pipeline_mode = #tpu.pipeline_mode<synchronous>, transform_indices = @transform_3, window_bounds = array<i64: 16, 8>}, {pipeline_mode = #tpu.pipeline_mode<synchronous>, transform_indices = @transform_4, window_bounds = array<i64: 16, 1>}, {transform_indices = @transform_5, window_bounds = array<i64: 1, 16, 16>}]} {
    %c0 = arith.constant 0 : index
    %c0_0 = arith.constant 0 : index
    %c0_1 = arith.constant 0 : index
    %0 = vector.load %arg2[%c0, %c0_0, %c0_1] : memref<1x8x16xf32, #tpu.memory_space<vmem>>, vector<1x8x16xf32>
    %1 = vector.shape_cast %0 : vector<1x8x16xf32> to vector<8x16xf32>
    %cst = arith.constant dense<0.000000e+00> : vector<16xf32>
    %2 = vector.multi_reduction <add>, %1, %cst [0] : vector<8x16xf32> to vector<16xf32>
    %3 = vector.shape_cast %2 : vector<16xf32> to vector<1x16xf32>
    %cst_2 = arith.constant 8.000000e+00 : f32
    %4 = vector.broadcast %cst_2 : f32 to vector<1x16xf32>
    %5 = arith.divf %3, %4 : vector<1x16xf32>
    %6 = vector.broadcast %5 : vector<1x16xf32> to vector<8x16xf32>
    %7 = arith.subf %1, %6 : vector<8x16xf32>
    %8 = arith.mulf %7, %7 : vector<8x16xf32>
    %cst_3 = arith.constant dense<0.000000e+00> : vector<16xf32>
    %9 = vector.multi_reduction <add>, %8, %cst_3 [0] : vector<8x16xf32> to vector<16xf32>
    %10 = vector.shape_cast %9 : vector<16xf32> to vector<1x16xf32>
    %cst_4 = arith.constant 8.000000e+00 : f32
    %11 = vector.broadcast %cst_4 : f32 to vector<1x16xf32>
    %12 = arith.divf %10, %11 : vector<1x16xf32>
    %cst_5 = arith.constant 9.99999974E-6 : f32
    %13 = vector.broadcast %cst_5 : f32 to vector<1x16xf32>
    %14 = arith.addf %12, %13 : vector<1x16xf32>
    %15 = math.rsqrt %14 : vector<1x16xf32>
    %16 = vector.broadcast %15 : vector<1x16xf32> to vector<8x16xf32>
    %17 = arith.mulf %7, %16 : vector<8x16xf32>
    %c0_6 = arith.constant 0 : index
    %c0_7 = arith.constant 0 : index
    %18 = vector.load %arg3[%c0_6, %c0_7] : memref<8x1xf32, #tpu.memory_space<vmem>>, vector<8x1xf32>
    %19 = vector.broadcast %18 : vector<8x1xf32> to vector<8x16xf32>
    %20 = arith.mulf %17, %19 : vector<8x16xf32>
    %c0_8 = arith.constant 0 : index
    %c0_9 = arith.constant 0 : index
    %21 = vector.load %arg4[%c0_8, %c0_9] : memref<8x1xf32, #tpu.memory_space<vmem>>, vector<8x1xf32>
    %22 = vector.broadcast %21 : vector<8x1xf32> to vector<8x16xf32>
    %23 = arith.addf %20, %22 : vector<8x16xf32>
    %c0_10 = arith.constant 0 : index
    %c0_11 = arith.constant 0 : index
    %24 = vector.load %arg5[%c0_10, %c0_11] : memref<16x8xf32, #tpu.memory_space<vmem>>, vector<16x8xf32>
    %cst_12 = arith.constant dense<0.000000e+00> : vector<16x16xf32>
    %25 = tpu.matmul %24, %23, %cst_12 {dimension_numbers = #tpu.dot_dimension_numbers<[1], [0], [0], [1], [0, 0, 1, 1], [], []>} : vector<16x8xf32>, vector<8x16xf32>, vector<16x16xf32> -> vector<16x16xf32>
    %c0_13 = arith.constant 0 : index
    %c0_14 = arith.constant 0 : index
    %26 = vector.load %arg6[%c0_13, %c0_14] : memref<16x1xf32, #tpu.memory_space<vmem>>, vector<16x1xf32>
    %27 = vector.broadcast %26 : vector<16x1xf32> to vector<16x16xf32>
    %28 = arith.addf %25, %27 : vector<16x16xf32>
    %cst_15 = arith.constant 0.000000e+00 : f32
    %29 = vector.broadcast %cst_15 : f32 to vector<16x16xf32>
    %30 = arith.maximumf %28, %29 : vector<16x16xf32>
    %c0_16 = arith.constant 0 : index
    %c0_17 = arith.constant 0 : index
    %c0_18 = arith.constant 0 : index
    %31 = vector.load %arg7[%c0_16, %c0_17, %c0_18] : memref<1x16x16xf32, #tpu.memory_space<vmem>>, vector<1x16x16xf32>
    %32 = vector.shape_cast %31 : vector<1x16x16xf32> to vector<16x16xf32>
    %33 = vector.shape_cast %30 : vector<16x16xf32> to vector<1x16x16xf32>
    tpu.vector_store %arg7[%c0_16, %c0_17, %c0_18], %33 {strides = array<i32>} : memref<1x16x16xf32, #tpu.memory_space<vmem>>, vector<1x16x16xf32>,
    return
  }
  func.func @transform_0(%arg0: i32, %arg1: i32) -> (i32, i32, i32) {
    %c0_i32 = arith.constant 0 : i32
    %c0_i32_0 = arith.constant 0 : i32
    return %arg0, %c0_i32, %arg1 : i32, i32, i32
  }
  func.func @transform_1(%arg0: i32, %arg1: i32) -> (i32, i32) {
    %c0_i32 = arith.constant 0 : i32
    %c0_i32_0 = arith.constant 0 : i32
    %c0_i32_1 = arith.constant 0 : i32
    return %c0_i32, %c0_i32_0 : i32, i32
  }
  func.func @transform_2(%arg0: i32, %arg1: i32) -> (i32, i32) {
    %c0_i32 = arith.constant 0 : i32
    %c0_i32_0 = arith.constant 0 : i32
    %c0_i32_1 = arith.constant 0 : i32
    return %c0_i32, %c0_i32_0 : i32, i32
  }
  func.func @transform_3(%arg0: i32, %arg1: i32) -> (i32, i32) {
    %c0_i32 = arith.constant 0 : i32
    %c0_i32_0 = arith.constant 0 : i32
    %c0_i32_1 = arith.constant 0 : i32
    return %c0_i32, %c0_i32_0 : i32, i32
  }
  func.func @transform_4(%arg0: i32, %arg1: i32) -> (i32, i32) {
    %c0_i32 = arith.constant 0 : i32
    %c0_i32_0 = arith.constant 0 : i32
    %c0_i32_1 = arith.constant 0 : i32
    return %c0_i32, %c0_i32_0 : i32, i32
  }
  func.func @transform_5(%arg0: i32, %arg1: i32) -> (i32, i32, i32) {
    %c0_i32 = arith.constant 0 : i32
    %c0_i32_0 = arith.constant 0 : i32
    return %arg0, %c0_i32, %arg1 : i32, i32, i32
  }
}

</mosaic_0001>

<bundles_post_ra>
// kernel: tpu_custom_call.1
= control target key start
LH: loop header
LB: loop body
LE: loop exit
PB: predicated region body
PF: predicated region fallthrough
CT: control target
= control target key end

     0   :  { %10 = vsyncpa [#allocation3], 0  ;;  %s811_s0 = inlined_call_operand.vmem [shape: f32[2,8,16], index: 0, kind: input, shape index: {}]   ;;  %s812_s1 = inlined_call_operand.vmem [shape: f32[8,1], index: 1, kind: input, shape index: {}]   ;;  %s813_s2 = inlined_call_operand.vmem [shape: f32[8,1], index: 2, kind: input, shape index: {}]   ;;  %s814_s3 = inlined_call_operand.vmem [shape: f32[16,8], index: 3, kind: input, shape index: {}]   ;;  %s815_s4 = inlined_call_operand.vmem [shape: f32[16,1], index: 4, kind: input, shape index: {}]   ;;  %s816_s5 = inlined_call_operand.hbm [shape: f32[2,16,16], index: 5, kind: output, shape index: {}]  }
   0x1   :  { %12 = vsyncpa [#allocation3 + $0x1], 0  ;;  %s672_s18 = smov 0   ;;  %s674_s19 = smov 0  }
   0x2   :  { %s676_s20 = smov 0   ;;  %s678_s21 = smov 0  }
   0x3   :  { %s680_s22 = smov 0   ;;  %s682_s23 = smov 0  }
   0x4 LB: > { %s473_s24 = sadd.s32 4294967295, %s636_s23   ;;  %s474_s25 = sadd.s32 4294967294, %s636_s23   ;;  %s636_s23 = sphi %s682_s23, %s18_s23   ;;  %s632_s22 = sphi %s680_s22, %s823_s22   ;;  %s628_s21 = sphi %s678_s21, %s822_s21   ;;  %s624_s20 = sphi %s676_s20, %s821_s20   ;;  %s620_s19 = sphi %s674_s19, %s820_s19   ;;  %s616_s18 = sphi %s672_s18, %s819_s18  }
   0x5   : > { %s30_s26 = sadd.s32 1, %s632_s22  ;;  %s151_s27 = sadd.s32 1, %s624_s20 }
   0x6   : > { %p32_p0 = scmp.ge.s32.totalorder %s30_s26, 2  ;;  %p161_p1 = scmp.ne.s32.totalorder %s624_s20, %s620_s19 }
   0x7   : > { %p162_p2 = scmp.eq.s32.totalorder %s473_s24, 1  ;;  %p167_p3 = scmp.ne.s32.totalorder %s620_s19, %s616_s18 }
   0x8   : > { %s825_s26 = smov (%p32_p0, %s30_s26), 0  ;;  %p168_p5 = scmp.eq.s32.totalorder %s474_s25, 1 }
   0x9   : > { %p712_p4 = por %p162_p2, %p161_p1  ;;  %s146_s29 = ssub.s32 %s632_s22, %s825_s26 }
   0xa   : > { %p477_p6 = scmp.ge.s32.totalorder %s636_s23, 1  ;;  %p149_p7 = scmp.eq.s32.totalorder %s146_s29, 0 }
   0xb   : > { %p719_p8 = por %p168_p5, %p167_p3  ;;  %p208_p9 = scmp.lt.s32.totalorder %s636_s23, 3 }
   0xc   : > { %s725_s6 = scalar_select %p149_p7, %s624_s20, %s151_s27  }
   0xd   : > { %p209_p10 = pnand %p477_p6, %p208_p9 }
   0xe   : > { %v269_v0 = vld [vmem:[%s812_s1] sm:$0xff] (!%p209_p10)  ;;  %v638_v1 = vmov (!%p209_p10), 0   ;;  %vm297_vm0 = vcmask (!%p209_p10), 64512   ;;  %v286_v5 = vld [vmem:[%s815_s4 + $0x8] sm:$0xff] (!%p209_p10)  ;;  %p238_p11 = scmp.lt.s32.totalorder (!%p209_p10), %s628_s21, 1  ;;  %vm246_vm1 = vcmask (!%p209_p10), 130048  }
   0xf   : > { %212 = sbr.rel (%p209_p10) target bundleno = 384 (0x180), region = 40  ;;  %554 = vset.pattern.permute.xlu0 (!%p209_p10), %v638_v1  ;;  %555 = vset.pattern.permute.xlu1 (!%p209_p10), %v638_v1  ;;  %v276_v2 = vld [vmem:[%s813_s2] sm:$0xff] (!%p209_p10)  ;;  %v284_v32 = vld [vmem:[%s814_s3 + $0x8] sm:$0xff] (!%p209_p10)  ;;  %s235_s9 = sand.u32 (!%p209_p10), 1, %s620_s19  }
  0x10   : > { %272 = vperm.xlu0 (!%p209_p10), %554, %v269_v0   ;;  %v283_v3 = vld [vmem:[%s814_s3] sm:$0xff] (!%p209_p10)  ;;  %s478_s10 = sshll.u32 (!%p209_p10), %s235_s9, 4  ;;  %s487_s13 = sshll.u32 (!%p209_p10), %s628_s21, 8 }
  0x11   : > { %493 = vmatprep.mubr.msk.f32.mxu0 (!%p209_p10), %vm297_vm0, %v283_v3  ;;  %v285_v4 = vld [vmem:[%s815_s4] sm:$0xff] (!%p209_p10)  ;;  %s237_s11 = scalar_lea.vmem (!%p209_p10), [#allocation2], %s478_s10  ;;  %s761_s16 = scalar_lea.hbm (!%p209_p10), %s816_s5, %s487_s13 }
  0x12   : > { %289 = vperm.xlu1 (!%p209_p10), %555, %v285_v4   ;;  %s398_s12 = sshll.u32 (!%p209_p10), %s237_s11, 4  ;;  %s756_s12 = int_to_ptr.vmem [resolvable:$true] %s398_s12 }
  0x14   : > { %279 = vperm.xlu0 (!%p209_p10), %554, %v276_v2  }
  0x16   : > { %294 = vperm.xlu1 %555, %v286_v5   ;;  %s239_s17 = scalar_select %p238_p11, %s628_s21, 1 }
  0x17   : > { %s765_s21 = scalar_lea.sflag [#allocation3], %s235_s9 }
  0x18   : > { %s479_s24 = sshll.u32 %s239_s17, 3  ;;  %s558_s17 = scalar_lea.vmem %s756_s12, 256 }
  0x19   : > { %s244_s29 = scalar_lea.vmem %s811_s0, %s479_s24  ;;  %p559_p12 = scmp.ne.s32.totalorder %s756_s12, %s558_s17 }
  0x1a   : > { %v245_v6 = vld [vmem:[%s244_s29] sm:$0xff]  ;;  %s639_s24 = smov [#allocation2]  }
  0x1b   : > { %v247_v7 = vsel %vm246_vm1, %v245_v6, 0.0  ;;  %p560_p13 = pnand %p559_p12, %p712_p4  ;;  %s562_s25 = sshll.u32 %s639_s24, 4  ;;  %s563_s25 = int_to_ptr.vmem [resolvable:$false] %s562_s25 }
  0x1c   : > { %v248_v8 = vrot.slane %v247_v7, 4  ;;  %s564_s27 = scalar_lea.vmem %s563_s25, 512  ;;  %p565_p1 = scmp.lt.s32.totalorder %s756_s12, %s563_s25 }
  0x1d   : > { %p561_p0 = pneg %p560_p13  ;;  %p566_p2 = scmp.lt.s32.totalorder %s564_s27, %s558_s17 }
  0x1e   : > { %v249_v9 = vadd.f32 %v248_v8, %v247_v7 }
  0x1f   : > { %p567_p3 = por %p566_p2, %p565_p1 }
  0x20   : > { %v250_v10 = vrot.slane %v249_v9, 2 }
  0x21   : > { %p568_p5 = pnand %p567_p3, %p561_p0 }
  0x22   : > { %v251_v11 = vadd.f32 %v250_v10, %v249_v9 }
  0x24   : > { %v252_v12 = vrot.slane %v251_v11, 1 }
  0x26   : > { %v253_v13 = vadd.f32 %v252_v12, %v251_v11 }
  0x28   : > { %v255_v14 = vmul.f32 0.125, %v253_v13 }
  0x2a   : > { %v256_v15 = vsub.f32 %v245_v6, %v255_v14 }
  0x2c   : > { %v257_v16 = vmul.f32 %v256_v15, %v256_v15 }
  0x2e   : > { %v258_v17 = vsel %vm246_vm1, %v257_v16, 0.0 }
  0x2f   : > { %v259_v18 = vrot.slane %v258_v17, 4 }
  0x31   : > { %v260_v19 = vadd.f32 %v259_v18, %v258_v17 }
  0x33   : > { %v261_v20 = vrot.slane %v260_v19, 2 }
  0x35   : > { %v262_v21 = vadd.f32 %v261_v20, %v260_v19 }
  0x37   : > { %v263_v22 = vrot.slane %v262_v21, 1 }
  0x39   : > { %v264_v23 = vadd.f32 %v263_v22, %v262_v21 }
  0x3b   : > { %v265_v24 = vmul.f32 0.125, %v264_v23 }
  0x3d   : > { %v266_v25 = vadd.f32 1e-05, %v265_v24 }
  0x3f   : > { %556 = vrsqrt.f32 %v266_v25 }
  0x49   : > { %v557_v26 = vpop.eup %556 }
  0x4a   : > { %v268_v27 = vmul.f32 %v557_v26, %v256_v15 }
  0x8f   : > { %v273_v28 = vpop.permute.xlu0 %272 }
  0x90   : > { %v275_v29 = vmul.f32 %v273_v28, %v268_v27 }
  0x91   : > { %v290_v33 = vpop.permute.xlu1 %289 }
  0x93   : > { %v280_v30 = vpop.permute.xlu0 %279 }
  0x94   : > { %v282_v31 = vadd.f32 %v280_v30, %v275_v29 }
  0x95   : > { %v295_v34 = vpop.permute.xlu1 %294 }
  0x96   : > { %491 = vmatprep.subr.mxu0 %v282_v31 }
  0x97   : > { %492 = vmatpush3.msra.mxu0 %v282_v31 }
  0x98   : > { %494 = vmatmul.mubr.msk.f32.vlgmr.msra.gmra.mrb[0].mxu0 %vm297_vm0, %v284_v32 }
 0x16b   : > { %v495_v35 = vpop.f32.mrb[0].mxu0 }
 0x16c   : > { %v376_v36 = vadd.f32 %v495_v35, %v295_v34  ;;  %v370_v37 = vpop.f32.mrb[1].mxu0 }
 0x16d   : > { %v371_v38 = vadd.f32 %v370_v37, %v290_v33 }
 0x16e   : > { %v380_v39 = vmax.f32 %v376_v36, 0.0 }
 0x16f   : > { %v379_v40 = vmax.f32 %v371_v38, 0.0 }
 0x170   : > { %382 = vst.msk [vmem:[%s237_s11 + $0x8] sm:$0xff] %vm246_vm1, %v380_v39 }
 0x171   : > { %381 = vst.msk [vmem:[%s237_s11] sm:$0xff] %vm246_vm1, %v379_v40 }
 0x172   : > { %571 = shalt.err (!%p568_p5)
}
 0x173   : > { %s572_s29 = scalar_lea.hbm %s761_s16, 256  ;;  %s576_s9 = scalar_lea.hbm %s816_s5, 512 }
 0x174   : > { %p573_p6 = scmp.ne.s32.totalorder %s761_s16, %s572_s29  ;;  %p577_p10 = scmp.lt.u32.totalorder %s761_s16, %s816_s5 }
 0x175   : > { %p578_p11 = scmp.lt.u32.totalorder %s576_s9, %s572_s29  ;;  %p580_p13 = scmp.lt.u32.totalorder %s572_s29, %s761_s16 }
 0x176   : > { %p574_p7 = pnand %p573_p6, %p712_p4 }
 0x177   : > { %p579_p12 = por %p578_p11, %p577_p10 }
 0x178   : > { %p575_p9 = pneg %p574_p7 }
 0x179   : > { %p581_p0 = por %p580_p13, %p579_p12 }
 0x17b   : > { %p582_p1 = pnand %p581_p0, %p575_p9 }
 0x17d   : > { %585 = shalt.err (!%p582_p1)
}
 0x17e   : > { %s640_s13 = smov 128   ;;  %s641_s14 = smov 8  }
 0x17f   : > { %496 = dma.vmem_to_hbm [thread:$0]  (%p712_p4), %s756_s12, 256, %s761_s16, %s765_s21, %s640_s13, %s640_s13, %s641_s14  }
 0x180 PF: > { %p502_p2 = scmp.ge.s32.totalorder %s636_s23, 2  ;;  %s413_s15 = sand.u32 1, %s616_s18  }
 0x181   : > { %s414_s17 = scalar_lea.sflag [#allocation3], %s413_s15 }
 0x182   : > { %p499_p3 = pnand %p502_p2, %p719_p8 }
 0x184   : > { %611 = dma.done.wait (!%p499_p3), %s414_s17, 256  }
 0x185   : > { %613 = vsyncadd (!%p499_p3), %s414_s17, 4294967040  ;;  %s18_s23 = sadd.s32 1, %s636_s23   ;;  %s819_s18 = smov %s620_s19 }
 0x186   : > { %p15_p5 = scmp.ge.s32.totalorder %s18_s23, 4   ;;  %s820_s19 = smov %s624_s20 }
 0x187   : > { %s821_s20 = smov %s725_s6  ;;  %s822_s21 = smov %s632_s22 }
 0x188   : > { %s823_s22 = smov %s825_s26  ;;  %17 = sbr.rel (!%p15_p5) target bundleno = 4 (0x4), region = 75 }
 0x18f   :  { %419 = vsyncpa [#allocation3], 1 }
 0x190   :  { %421 = vsyncpa [#allocation3 + $0x1], 1 }

</bundles_post_ra>
